<compile_context>
chip_gen: v5e
topology: v5e:2x2
jax: 0.10.0
libtpu: 0.0.40
codegen_flags: <defaults>
</compile_context>

<pallas_src>
import jax
import jax.numpy as jnp
from jax.experimental import pallas as pl
from jax.experimental.pallas import tpu as pltpu

LANE = 128
TILE_ALIGN = 16  # multiple of 8 (f32 sublane) and 16 (bf16 sublane packing)


def _round_up(n, m):
    return (n + m - 1) // m * m


def policy_kernel(x_ref, w1_ref, b1_ref, w2_ref, b2_ref, o_ref):
    # In-kernel bf16 cast of the x tile (VPU, overlaps the pipeline DMAs) instead of
    # a separate wrapper-side astype pass over x in HBM.
    x = x_ref[...].astype(jnp.bfloat16)
    # fc1: native bf16 MXU, f32 accumulation; bias + relu on the VPU in f32.
    h = jnp.dot(x, w1_ref[...], preferred_element_type=jnp.float32)
    h = jnp.maximum(h + b1_ref[...], 0.0)
    # fc2: bf16 MXU inputs again (halves the h temporary), f32 accumulation.
    logits = jnp.dot(h.astype(jnp.bfloat16), w2_ref[...],
                     preferred_element_type=jnp.float32)
    logits = logits + b2_ref[...]
    # Numerically-stable softmax over the lane-dense (128-padded) last axis.
    # Padded lanes carry a float32-min bias, so exp(pad - max) == 0 exactly and the
    # row sum is unchanged.
    m = jnp.max(logits, axis=-1, keepdims=True)
    e = jnp.exp(logits - m)
    denom = jnp.sum(e, axis=-1, keepdims=True)
    # Exact divide (not approx reciprocal): rows normalize to 1 up to bf16 output
    # rounding; this kernel is HBM-bound, so the EUP cost is fully hidden.
    o_ref[...] = (e / denom).astype(o_ref.dtype)


def policy_network(x, w1, b1, w2, b2, *, tile_b=None, unpad_output=True):
    """Fused fc1 -> relu -> fc2 -> softmax.

    x:  [B, D_in] float32
    w1: [D_in, H]  (fc1.weight.T), b1: [H]
    w2: [H, D_out] (fc2.weight.T), b2: [D_out]

    Returns [B, D_out] float32 probabilities (unpad_output=True, module semantics),
    or the lane-padded bf16 [B, round_up(D_out,128)] slab (padded lanes exactly 0)
    when unpad_output=False, which skips the compaction pass for perf-critical use.
    """
    x = jnp.asarray(x, jnp.float32)
    B, D_in = x.shape
    H = w1.shape[1]
    D_out = w2.shape[1]

    # ---- batch tiling ---------------------------------------------------------
    # Large tiles amortize the ~0.35us/grid-step overhead; keep >= 2 grid steps
    # when the batch allows it so both v7x TensorCores split the parallel axis.
    if tile_b is None:
        if B <= 2 * TILE_ALIGN:
            tile_b = _round_up(B, TILE_ALIGN)
        else:
            tile_b = min(4096, _round_up(pl.cdiv(B, 2), TILE_ALIGN))
    tile_b = max(TILE_ALIGN, _round_up(tile_b, TILE_ALIGN))
    grid_b = pl.cdiv(B, tile_b)  # ragged last tile handled by Pallas block masking

    # ---- lane-dense output: pad fc2 columns to a full 128-lane slab ------------
    N_pad = _round_up(D_out, LANE)
    b1 = jnp.asarray(b1, jnp.float32).reshape(1, H)
    b2 = jnp.asarray(b2, jnp.float32).reshape(1, D_out)
    w2 = jnp.asarray(w2, jnp.float32)
    if N_pad != D_out:
        neg = float(jnp.finfo(jnp.float32).min)
        w2 = jnp.pad(w2, ((0, 0), (0, N_pad - D_out)))
        b2 = jnp.pad(b2, ((0, 0), (0, N_pad - D_out)), constant_values=neg)

    # Tiny one-time weight casts (x itself is cast to bf16 inside the kernel).
    w1_bf = jnp.asarray(w1, jnp.float32).astype(jnp.bfloat16)
    w2_bf = w2.astype(jnp.bfloat16)

    # Weights / biases are grid-invariant -> single pipeline buffer.
    const = dict(pipeline_mode=pl.Buffered(buffer_count=1))

    cost = pl.CostEstimate(
        flops=int(2 * B * (D_in * H + H * N_pad)),
        transcendentals=int(B * N_pad),
        bytes_accessed=int(
            x.size * 4 + w1_bf.size * 2 + b1.size * 4
            + w2_bf.size * 2 + b2.size * 4 + B * N_pad * 2
        ),
    )

    out = pl.pallas_call(
        policy_kernel,
        out_shape=jax.ShapeDtypeStruct((B, N_pad), jnp.bfloat16),
        grid_spec=pltpu.PrefetchScalarGridSpec(
            num_scalar_prefetch=0,
            grid=(grid_b,),
            in_specs=[
                pl.BlockSpec((tile_b, D_in), lambda i: (i, 0)),       # x tile (f32, pipelined)
                pl.BlockSpec((D_in, H), lambda i: (0, 0), **const),   # W1 bf16 (resident)
                pl.BlockSpec((1, H), lambda i: (0, 0), **const),      # b1 f32
                pl.BlockSpec((H, N_pad), lambda i: (0, 0), **const),  # W2 bf16 (padded, resident)
                pl.BlockSpec((1, N_pad), lambda i: (0, 0), **const),  # b2 f32 (pad lanes = f32 min)
            ],
            out_specs=pl.BlockSpec((tile_b, N_pad), lambda i: (i, 0)),
        ),
        compiler_params=pltpu.CompilerParams(
            dimension_semantics=("parallel",),
            # 32 MiB scoped VMEM: headroom over v5e's 16 MiB default at tile_b=4096,
            # while staying within v7x's 64 MiB physical / 32 MiB default.
            vmem_limit_bytes=32 * 1024 * 1024,
        ),
        cost_estimate=cost,
    )(x, w1_bf, b1, w2_bf, b2)

    if unpad_output:
        # Module-exact result. This is one extra (small) XLA pass; perf-critical
        # consumers should pass unpad_output=False and read the first D_out lanes.
        return out[:, :D_out].astype(jnp.float32)
    return out


if __name__ == "__main__":
    # Small shapes consistent with the module: batch=8, input_dim=32, output_dim=16.
    B, D_in, H, D_out = 8, 32, 128, 16

    key = jax.random.PRNGKey(0)
    kx, k1, kb1, k2, kb2 = jax.random.split(key, 5)

    bound1 = 1.0 / (D_in ** 0.5)
    bound2 = 1.0 / (H ** 0.5)
    x  = jax.random.normal(kx, (B, D_in), dtype=jnp.float32)
    w1 = jax.random.uniform(k1,  (D_in, H),  minval=-bound1, maxval=bound1, dtype=jnp.float32)
    b1 = jax.random.uniform(kb1, (H,),       minval=-bound1, maxval=bound1, dtype=jnp.float32)
    w2 = jax.random.uniform(k2,  (H, D_out), minval=-bound2, maxval=bound2, dtype=jnp.float32)
    b2 = jax.random.uniform(kb2, (D_out,),   minval=-bound2, maxval=bound2, dtype=jnp.float32)

    def ref_fn(xv):
        h = jnp.maximum(xv @ w1 + b1[None, :], 0.0)
        return jax.nn.softmax(h @ w2 + b2[None, :], axis=-1)

    # Case 1: small batch, default tiling (single grid step, ragged block masked).
    out = jax.block_until_ready(policy_network(x, w1, b1, w2, b2))
    ref = ref_fn(x)
    assert out.shape == (B, D_out) and out.dtype == jnp.float32
    # bf16 inputs / intermediates / output -> relaxed tolerances.
    assert jnp.allclose(out, ref, atol=2e-2, rtol=2e-2), float(jnp.max(jnp.abs(out - ref)))
    assert jnp.allclose(jnp.sum(out, axis=-1), 1.0, atol=1e-2)

    # Case 2: ragged batch + multi-step grid (exercises tiling / masking paths).
    B2 = 20
    x2 = jax.random.normal(jax.random.PRNGKey(1), (B2, D_in), dtype=jnp.float32)
    out2 = jax.block_until_ready(policy_network(x2, w1, b1, w2, b2, tile_b=16))
    ref2 = ref_fn(x2)
    assert out2.shape == (B2, D_out)
    assert jnp.allclose(out2, ref2, atol=2e-2, rtol=2e-2), float(jnp.max(jnp.abs(out2 - ref2)))
    assert jnp.allclose(jnp.sum(out2, axis=-1), 1.0, atol=1e-2)

    # Case 3: perf path — lane-padded bf16 output, padded lanes are exactly zero.
    out3 = jax.block_until_ready(policy_network(x2, w1, b1, w2, b2, unpad_output=False))
    assert out3.shape == (B2, 128) and out3.dtype == jnp.bfloat16
    assert jnp.all(out3[:, D_out:] == 0)
    assert jnp.allclose(out3[:, :D_out].astype(jnp.float32), ref2, atol=2e-2, rtol=2e-2)

    print("KERNEL_OK")
</pallas_src>

<mosaic_0001>
module attributes {stable_mosaic.version = 11 : i64} {
  func.func @policy_kernel(%arg0: i32, %arg1: memref<16x32xf32, #tpu.memory_space<vmem>>, %arg2: memref<32x128xbf16, #tpu.memory_space<vmem>>, %arg3: memref<1x128xf32, #tpu.memory_space<vmem>>, %arg4: memref<128x128xbf16, #tpu.memory_space<vmem>>, %arg5: memref<1x128xf32, #tpu.memory_space<vmem>>, %arg6: memref<16x128xbf16, #tpu.memory_space<vmem>>) attributes {dimension_semantics = [#tpu.dimension_semantics<parallel>], iteration_bounds = array<i64: 1>, scalar_prefetch = 0 : i64, scratch_operands = 0 : i64, tpu.core_type = #tpu.core_type<tc>, window_params = [{transform_indices = @transform_0, window_bounds = array<i64: 16, 32>}, {pipeline_mode = #tpu.pipeline_mode<synchronous>, transform_indices = @transform_1, window_bounds = array<i64: 32, 128>}, {pipeline_mode = #tpu.pipeline_mode<synchronous>, transform_indices = @transform_2, window_bounds = array<i64: 1, 128>}, {pipeline_mode = #tpu.pipeline_mode<synchronous>, transform_indices = @transform_3, window_bounds = array<i64: 128, 128>}, {pipeline_mode = #tpu.pipeline_mode<synchronous>, transform_indices = @transform_4, window_bounds = array<i64: 1, 128>}, {transform_indices = @transform_5, window_bounds = array<i64: 16, 128>}]} {
    %c0 = arith.constant 0 : index
    %c0_0 = arith.constant 0 : index
    %0 = vector.load %arg1[%c0, %c0_0] : memref<16x32xf32, #tpu.memory_space<vmem>>, vector<16x32xf32>
    %1 = arith.truncf %0 : vector<16x32xf32> to vector<16x32xbf16>
    %c0_1 = arith.constant 0 : index
    %c0_2 = arith.constant 0 : index
    %2 = vector.load %arg2[%c0_1, %c0_2] : memref<32x128xbf16, #tpu.memory_space<vmem>>, vector<32x128xbf16>
    %cst = arith.constant dense<0.000000e+00> : vector<16x128xf32>
    %3 = tpu.matmul %1, %2, %cst {dimension_numbers = #tpu.dot_dimension_numbers<[1], [0], [0], [1], [0, 0, 1, 1], [], []>} : vector<16x32xbf16>, vector<32x128xbf16>, vector<16x128xf32> -> vector<16x128xf32>
    %c0_3 = arith.constant 0 : index
    %c0_4 = arith.constant 0 : index
    %4 = vector.load %arg3[%c0_3, %c0_4] : memref<1x128xf32, #tpu.memory_space<vmem>>, vector<1x128xf32>
    %5 = vector.broadcast %4 : vector<1x128xf32> to vector<16x128xf32>
    %6 = arith.addf %3, %5 : vector<16x128xf32>
    %cst_5 = arith.constant 0.000000e+00 : f32
    %7 = vector.broadcast %cst_5 : f32 to vector<16x128xf32>
    %8 = arith.maximumf %6, %7 : vector<16x128xf32>
    %9 = arith.truncf %8 : vector<16x128xf32> to vector<16x128xbf16>
    %c0_6 = arith.constant 0 : index
    %c0_7 = arith.constant 0 : index
    %10 = vector.load %arg4[%c0_6, %c0_7] : memref<128x128xbf16, #tpu.memory_space<vmem>>, vector<128x128xbf16>
    %cst_8 = arith.constant dense<0.000000e+00> : vector<16x128xf32>
    %11 = tpu.matmul %9, %10, %cst_8 {dimension_numbers = #tpu.dot_dimension_numbers<[1], [0], [0], [1], [0, 0, 1, 1], [], []>} : vector<16x128xbf16>, vector<128x128xbf16>, vector<16x128xf32> -> vector<16x128xf32>
    %c0_9 = arith.constant 0 : index
    %c0_10 = arith.constant 0 : index
    %12 = vector.load %arg5[%c0_9, %c0_10] : memref<1x128xf32, #tpu.memory_space<vmem>>, vector<1x128xf32>
    %13 = vector.broadcast %12 : vector<1x128xf32> to vector<16x128xf32>
    %14 = arith.addf %11, %13 : vector<16x128xf32>
    %cst_11 = arith.constant dense<0xFF800000> : vector<16xf32>
    %15 = vector.multi_reduction <maximumf>, %14, %cst_11 [1] : vector<16x128xf32> to vector<16xf32>
    %16 = vector.shape_cast %15 : vector<16xf32> to vector<16x1xf32>
    %17 = vector.broadcast %16 : vector<16x1xf32> to vector<16x128xf32>
    %18 = arith.subf %14, %17 : vector<16x128xf32>
    %19 = math.exp %18 : vector<16x128xf32>
    %cst_12 = arith.constant dense<0.000000e+00> : vector<16xf32>
    %20 = vector.multi_reduction <add>, %19, %cst_12 [1] : vector<16x128xf32> to vector<16xf32>
    %21 = vector.shape_cast %20 : vector<16xf32> to vector<16x1xf32>
    %22 = vector.broadcast %21 : vector<16x1xf32> to vector<16x128xf32>
    %23 = arith.divf %19, %22 : vector<16x128xf32>
    %24 = arith.truncf %23 : vector<16x128xf32> to vector<16x128xbf16>
    %c0_13 = arith.constant 0 : index
    %c0_14 = arith.constant 0 : index
    %25 = vector.load %arg6[%c0_13, %c0_14] : memref<16x128xbf16, #tpu.memory_space<vmem>>, vector<16x128xbf16>
    tpu.vector_store %arg6[%c0_13, %c0_14], %24 {strides = array<i32>} : memref<16x128xbf16, #tpu.memory_space<vmem>>, vector<16x128xbf16>,
    return
  }
  func.func @transform_0(%arg0: i32) -> (i32, i32) {
    %c0_i32 = arith.constant 0 : i32
    %c0_i32_0 = arith.constant 0 : i32
    return %arg0, %c0_i32 : i32, i32
  }
  func.func @transform_1(%arg0: i32) -> (i32, i32) {
    %c0_i32 = arith.constant 0 : i32
    %c0_i32_0 = arith.constant 0 : i32
    %c0_i32_1 = arith.constant 0 : i32
    return %c0_i32, %c0_i32_0 : i32, i32
  }
  func.func @transform_2(%arg0: i32) -> (i32, i32) {
    %c0_i32 = arith.constant 0 : i32
    %c0_i32_0 = arith.constant 0 : i32
    %c0_i32_1 = arith.constant 0 : i32
    return %c0_i32, %c0_i32_0 : i32, i32
  }
  func.func @transform_3(%arg0: i32) -> (i32, i32) {
    %c0_i32 = arith.constant 0 : i32
    %c0_i32_0 = arith.constant 0 : i32
    %c0_i32_1 = arith.constant 0 : i32
    return %c0_i32, %c0_i32_0 : i32, i32
  }
  func.func @transform_4(%arg0: i32) -> (i32, i32) {
    %c0_i32 = arith.constant 0 : i32
    %c0_i32_0 = arith.constant 0 : i32
    %c0_i32_1 = arith.constant 0 : i32
    return %c0_i32, %c0_i32_0 : i32, i32
  }
  func.func @transform_5(%arg0: i32) -> (i32, i32) {
    %c0_i32 = arith.constant 0 : i32
    %c0_i32_0 = arith.constant 0 : i32
    return %arg0, %c0_i32 : i32, i32
  }
}

</mosaic_0001>

<bundles_post_ra>
// kernel: tpu_custom_call.1
= control target key start
LH: loop header
LB: loop body
LE: loop exit
PB: predicated region body
PF: predicated region fallthrough
CT: control target
= control target key end

     0   :  { %10 = vsyncpa [#allocation3], 0  ;;  %s504_s0 = inlined_call_operand.hbm [shape: f32[8,32], index: 0, kind: input, shape index: {}]   ;;  %s505_s1 = inlined_call_operand.hbm [shape: bf16[32,128], index: 1, kind: input, shape index: {}]   ;;  %s506_s2 = inlined_call_operand.vmem [shape: f32[1,128], index: 2, kind: input, shape index: {}]   ;;  %s507_s3 = inlined_call_operand.hbm [shape: bf16[128,128], index: 3, kind: input, shape index: {}]   ;;  %s508_s4 = inlined_call_operand.vmem [shape: f32[1,128], index: 4, kind: input, shape index: {}]   ;;  %s509_s5 = inlined_call_operand.hbm [shape: bf16[8,128], index: 5, kind: output, shape index: {}]  }
   0x1   :  { %11 = vsyncpa [#allocation6], 0 }
   0x2   :  { %12 = vsyncpa [#allocation4], 0  ;;  %s30_s20 = sshll.u32 %s505_s1, 4  ;;  %s31_s20 = int_to_ptr.hbm [resolvable:$true] %s30_s20 }
   0x3   :  { %16 = vsyncadd [#allocation3], 128  ;;  %s439_s21 = smov [#allocation5]   ;;  %s17_s25 = sshll.u32 %s504_s0, 4  ;;  %s18_s25 = int_to_ptr.hbm [resolvable:$true] %s17_s25 }
   0x4   :  { %s32_s22 = sshll.u32 %s439_s21, 4  ;;  %s440_s26 = smov 64   ;;  %s33_s22 = int_to_ptr.vmem [resolvable:$true] %s32_s22 }
   0x5   :  { %s441_s27 = smov 4   ;;  %s442_s28 = smov [#allocation2]  }
   0x6   :  { %38 = dma.hbm_to_vmem [thread:$0]  %s31_s20, 256, %s33_s22, [#allocation6], %s440_s26, %s440_s26, %s441_s27  }
   0x7   :  { %s19_s29 = sshll.u32 %s442_s28, 4  ;;  %s443_s1 = smov 128   ;;  %s20_s29 = int_to_ptr.vmem [resolvable:$true] %s19_s29 }
   0x8   :  { %s444_s30 = smov 8   ;;  %s45_s8 = sshll.u32 %s507_s3, 4  ;;  %s46_s8 = int_to_ptr.hbm [resolvable:$true] %s45_s8 }
   0x9   :  { %25 = dma.hbm_to_vmem [thread:$0]  %s18_s25, 128, %s20_s29, [#allocation3], %s443_s1, %s443_s1, %s444_s30  }
   0xa   :  { %s445_s9 = smov [#allocation7]  }
   0xb   :  { %s47_s0 = sshll.u32 %s445_s9, 4  ;;  %s48_s0 = int_to_ptr.vmem [resolvable:$true] %s47_s0 }
   0xc   :  { %53 = dma.hbm_to_vmem [thread:$0]  %s46_s8, 1024, %s48_s0, [#allocation6], %s440_s26, %s440_s26, %s441_s27  }
   0xd   :  { %433 = dma.done.wait [#allocation3], 256  }
   0xe   :  { %434 = vsyncadd [#allocation3], 4294967040 }
   0xf   :  { %435 = dma.done.wait [#allocation6], 1280  }
  0x10   :  { %436 = vsyncadd [#allocation6], 4294966016  ;;  %v305_v0 = vld [vmem:[#allocation5 + $0x8] sm:$0xff]  ;;  %v304_v1 = vld [vmem:[#allocation5] sm:$0xff]  ;;  %vm92_vm0 = vcmask 261120  }
  0x11   :  { %v313_v2 = vld [vmem:[#allocation7 + $0x38] sm:$0xff]  ;;  %102 = vmatpush.bf16.msra.mxu0 %v305_v0  ;;  %v69_v3 = vld [vmem:[#allocation2] sm:$0xff]  ;;  %v70_v4 = vld [vmem:[#allocation2 + $0x8] sm:$0xff] }
  0x12   :  { %181 = vmatpush.bf16.msra.mxu1 %v313_v2  ;;  %v312_v5 = vld [vmem:[#allocation7 + $0x30] sm:$0xff]  ;;  %v71_v6 = vpack.c.bf16 %v70_v4, %v69_v3  ;;  %v311_v7 = vld [vmem:[#allocation7 + $0x28] sm:$0xff]  ;;  %v310_v8 = vld [vmem:[#allocation7 + $0x20] sm:$0xff] }
  0x13   :  { %v309_v9 = vld [vmem:[#allocation7 + $0x18] sm:$0xff]  ;;  %v308_v10 = vld [vmem:[#allocation7 + $0x10] sm:$0xff]  ;;  %v307_v11 = vld [vmem:[#allocation7 + $0x8] sm:$0xff] }
  0x14   :  { %v306_v12 = vld [vmem:[#allocation7] sm:$0xff] }
  0x15   :  { %103 = vmatpush.bf16.msra.mxu0 %v304_v1  ;;  %v327_v14 = vld [vmem:[%s506_s2] ss:$0 sm:$0xff] }
  0x16   :  { %182 = vmatpush.bf16.msra.mxu1 %v312_v5  ;;  %v328_v21 = vld [vmem:[%s508_s4] ss:$0 sm:$0xff] }
  0x18   :  { %271 = vmatmul.msk.bf16.vlgmr.msra.gmra.mxu0 %vm92_vm0, %v71_v6 }
  0x1a   :  { %183 = vmatpush.bf16.msra.mxu1 %v311_v7 }
  0x1e   :  { %184 = vmatpush.bf16.msra.mxu1 %v310_v8 }
  0x22   :  { %185 = vmatpush.bf16.msra.mxu1 %v309_v9 }
  0x26   :  { %186 = vmatpush.bf16.msra.mxu1 %v308_v10 }
  0x2a   :  { %187 = vmatpush.bf16.msra.mxu1 %v307_v11 }
  0x2e   :  { %188 = vmatpush.bf16.msra.mxu1 %v306_v12 }
  0x95   :  { %v105_v13 = vpop.f32.mrf.mxu0 }
  0x96   :  { %v106_v15 = vadd.f32 %v327_v14, %v105_v13 }
  0x98   :  { %v110_v18 = vmax.f32 %v106_v15, 0.0 }
  0x9d   :  { %v107_v16 = vpop.f32.mrf.mxu0 }
  0x9e   :  { %v108_v17 = vadd.f32 %v327_v14, %v107_v16 }
  0xa0   :  { %v111_v19 = vmax.f32 %v108_v17, 0.0 }
  0xa2   :  { %v112_v20 = vpack.c.bf16 %v111_v19, %v110_v18 }
  0xa4   :  { %189 = vmatmul.bf16.vlgmr.msra.gmra.mxu1 %v112_v20 }
 0x121   :  { %v190_v22 = vpop.f32.mrf.mxu1 }
 0x122   :  { %v191_v23 = vadd.f32 %v328_v21, %v190_v22 }
 0x124   :  { %195 = vmax.xlane.f32.xlu0 %v191_v23 }
 0x129   :  { %v192_v24 = vpop.f32.mrf.mxu1 }
 0x12a   :  { %v193_v25 = vadd.f32 %v328_v21, %v192_v24 }
 0x12c   :  { %197 = vmax.xlane.f32.xlu0 %v193_v25 }
 0x197   :  { %v196_v26 = vpop.xlane.xlu0 %195 }
 0x198   :  { %v199_v27 = vsub.f32 %v191_v23, %v196_v26 }
 0x19a   :  { %v201_v28 = vmul.f32 1.442695, %v199_v27 }
 0x19c   :  { %329 = vpow2.f32 %v201_v28 }
 0x19f   :  { %v198_v29 = vpop.xlane.xlu0 %197 }
 0x1a0   :  { %v200_v30 = vsub.f32 %v193_v25, %v198_v29 }
 0x1a2   :  { %v330_v31 = vpop.eup %329  ;;  %v203_v32 = vmul.f32 1.442695, %v200_v30 }
 0x1a3   :  { %205 = vadd.xlane.f32.xlu1 %v330_v31 }
 0x1a4   :  { %331 = vpow2.f32 %v203_v32 }
 0x1aa   :  { %v332_v33 = vpop.eup %331 }
 0x1ab   :  { %207 = vadd.xlane.f32.xlu1 %v332_v33 }
 0x216   :  { %v206_v34 = vpop.xlane.xlu1 %205 }
 0x217   :  { %333 = vrcp.f32 %v206_v34  ;;  %v220_v43 = vand.u32 2147483648, %v206_v34  ;;  %vm214_vm2 = vweird.f32 %v206_v34  ;;  %v218_v44 = vand.u32 2147483647, %v206_v34 }
 0x219   :  { %v221_v50 = vor.u32 1.1754944e-38, %v220_v43  ;;  %vm219_vm5 = vcmp.eq.f32.partialorder %v218_v44, 8.507059e+37 }
 0x21d   :  { %v334_v35 = vpop.eup %333 }
 0x21e   :  { %v210_v36 = vmul.f32 %v334_v35, %v206_v34  ;;  %v208_v37 = vpop.xlane.xlu1 %207  ;;  %vm215_vm1 = vweird.f32 %v334_v35 }
 0x21f   :  { %335 = vrcp.f32 %v208_v37  ;;  %vm216_vm3 = vmor %vm214_vm2, %vm215_vm1  ;;  %v235_v46 = vand.u32 2147483648, %v208_v37  ;;  %v233_v49 = vand.u32 2147483647, %v208_v37  ;;  %vm229_vm6 = vweird.f32 %v208_v37 }
 0x220   :  { %v211_v38 = vsub.f32 1.0, %v210_v36 }
 0x221   :  { %v236_v53 = vor.u32 1.1754944e-38, %v235_v46  ;;  %vm234_vm8 = vcmp.eq.f32.partialorder %v233_v49, 8.507059e+37 }
 0x222   :  { %v212_v39 = vmul.f32 %v334_v35, %v211_v38 }
 0x224   :  { %v213_v41 = vadd.f32 %v334_v35, %v212_v39 }
 0x225   :  { %v336_v40 = vpop.eup %335 }
 0x226   :  { %v225_v42 = vmul.f32 %v336_v40, %v208_v37  ;;  %v217_v47 = vsel %vm216_vm3, %v334_v35, %v213_v41  ;;  %vm230_vm4 = vweird.f32 %v336_v40 }
 0x227   :  { %v222_v52 = vsel %vm219_vm5, %v221_v50, %v217_v47  ;;  %vm231_vm7 = vmor %vm229_vm6, %vm230_vm4 }
 0x228   :  { %v226_v45 = vsub.f32 1.0, %v225_v42  ;;  %v223_v56 = vmul.f32 %v330_v31, %v222_v52 }
 0x22a   :  { %v227_v48 = vmul.f32 %v336_v40, %v226_v45 }
 0x22c   :  { %v228_v51 = vadd.f32 %v336_v40, %v227_v48 }
 0x22e   :  { %v232_v54 = vsel %vm231_vm7, %v336_v40, %v228_v51 }
 0x22f   :  { %v237_v55 = vsel %vm234_vm8, %v236_v53, %v232_v54 }
 0x230   :  { %v238_v57 = vmul.f32 %v332_v33, %v237_v55 }
 0x232   :  { %v317_v58 = vpack.c.bf16 %v238_v57, %v223_v56 }
 0x234   :  { %318 = vst [vmem:[#allocation8] sm:$0xff] %v317_v58  }
 0x235   :  { %246 = vsyncadd [#allocation4], 64  ;;  %s249_s13 = sshll.u32 %s509_s5, 4  ;;  %s446_s14 = smov [#allocation8]   ;;  %s250_s13 = int_to_ptr.hbm [resolvable:$true] %s249_s13 }
 0x236   :  { %s247_s15 = sshll.u32 %s446_s14, 4  ;;  %s248_s15 = int_to_ptr.vmem [resolvable:$true] %s247_s15 }
 0x237   :  { %255 = dma.vmem_to_hbm [thread:$0]  %s248_s15, 64, %s250_s13, [#allocation4], %s440_s26, %s440_s26, %s441_s27  }
 0x238   :  { %437 = dma.done.wait [#allocation4], 128  }
 0x239   :  { %438 = vsyncadd [#allocation4], 4294967168 }
 0x23a   :  { %260 = vsyncpa [#allocation3], 1 }
 0x23b   :  { %261 = vsyncpa [#allocation6], 1 }
 0x23c   :  { %262 = vsyncpa [#allocation4], 1 }

</bundles_post_ra>
